<compile_context>
chip_gen: v7x
topology: tpu7x:2x2x1
jax: 0.10.0
libtpu: 0.0.40
codegen_flags: <defaults>
</compile_context>

<pallas_src>
import jax
import jax.numpy as jnp
from jax.experimental import pallas as pl
from jax.experimental.pallas import tpu as pltpu


def _gru_recurrence_kernel(gates_ref, mask_ref, whh_ref, h_ref):
    """One grid step == CHUNK GRU time steps.

    gates_ref: (CHUNK, B, 3H) precomputed x_t @ W_ih + b_ih  (r|i|n order)
    mask_ref : (CHUNK, B, 1)
    whh_ref  : (H, 3H) fused hidden-to-hidden weights (bias_hh=False)
    h_ref    : (B, H) output block; constant block index across the grid, so
               it stays resident in VMEM and carries the recurrence.
    """
    c = pl.program_id(0)

    @pl.when(c == 0)
    def _():
        h_ref[...] = jnp.zeros_like(h_ref)

    H = h_ref.shape[-1]
    n_steps = gates_ref.shape[0]
    whh = whh_ref[...]                      # hoisted out of the loop

    def step(t, h):
        g = gates_ref[t]                    # (B, 3H) input pre-activations
        m = mask_ref[t]                     # (B, 1)
        hh = jnp.dot(h, whh, preferred_element_type=jnp.float32)   # (B, 3H)
        r = jax.nn.sigmoid(g[:, 0:H] + hh[:, 0:H])
        i = jax.nn.sigmoid(g[:, H:2 * H] + hh[:, H:2 * H])
        n = jnp.tanh(g[:, 2 * H:3 * H] + r * hh[:, 2 * H:3 * H])
        h_new = (1.0 - i) * n + i * h
        # hx = hx_new * mask + hx * (1 - mask)
        return h_new * m + h * (1.0 - m)

    h = jax.lax.fori_loop(0, n_steps, step, h_ref[...],
                          unroll=min(n_steps, 8))
    h_ref[...] = h


def bayesian_gru_forward(x, mask, params, *, chunk=8):
    """x: (B, S, I) float32 (batch-first, like the PyTorch module),
    mask: (B, S) float32 in {0,1}.  Returns the final hidden state hx of shape
    (B, H) (what BayesianGRU.forward returns)."""
    B, S, I = x.shape
    W_ih, b_ih, W_hh = params["W_ih"], params["b_ih"], params["W_hh"]
    H = W_hh.shape[0]

    # One large fully parallel input projection (MXU-saturating), produced
    # directly time-major so there is no extra transpose pass over x in HBM.
    gates = jnp.einsum("bsi,io->sbo", x, W_ih) + b_ih          # (S, B, 3H)
    mask_t = jnp.transpose(mask, (1, 0))[:, :, None].astype(gates.dtype)  # (S,B,1)

    # Pad batch to a multiple of 8 sublanes, sequence to a multiple of chunk.
    # Padded rows/steps have mask == 0, so they are exact no-ops.
    B_pad = ((B + 7) // 8) * 8
    n_chunks = pl.cdiv(S, chunk)
    S_pad = n_chunks * chunk
    gates = jnp.pad(gates, ((0, S_pad - S), (0, B_pad - B), (0, 0)))
    mask_t = jnp.pad(mask_t, ((0, S_pad - S), (0, B_pad - B), (0, 0)))

    grid_spec = pltpu.PrefetchScalarGridSpec(
        num_scalar_prefetch=0,
        grid=(n_chunks,),
        in_specs=[
            pl.BlockSpec((chunk, B_pad, 3 * H), lambda c: (c, 0, 0)),  # gates
            pl.BlockSpec((chunk, B_pad, 1), lambda c: (c, 0, 0)),      # mask
            pl.BlockSpec((H, 3 * H), lambda c: (0, 0)),                # W_hh
        ],
        out_specs=pl.BlockSpec((B_pad, H), lambda c: (0, 0)),          # resident h
    )

    h = pl.pallas_call(
        _gru_recurrence_kernel,
        out_shape=jax.ShapeDtypeStruct((B_pad, H), jnp.float32),
        grid_spec=grid_spec,
        compiler_params=pltpu.CompilerParams(
            dimension_semantics=("arbitrary",),   # time recurrence => serial
            vmem_limit_bytes=64 * 1024 * 1024),
    )(gates, mask_t, W_hh)

    return h[:B]


def bayesian_gru_reference(x, mask, params):
    """Pure-JAX reference mirroring the PyTorch module (eval-mode dropout)."""
    B, S, I = x.shape
    W_ih, b_ih, W_hh = params["W_ih"], params["b_ih"], params["W_hh"]
    H = W_hh.shape[0]
    h = jnp.zeros((B, H), jnp.float32)
    for t in range(S):
        xt = x[:, t, :]
        mt = mask[:, t][:, None]
        g = xt @ W_ih + b_ih
        hh = h @ W_hh
        r = jax.nn.sigmoid(g[:, 0:H] + hh[:, 0:H])
        i = jax.nn.sigmoid(g[:, H:2 * H] + hh[:, H:2 * H])
        n = jnp.tanh(g[:, 2 * H:3 * H] + r * hh[:, 2 * H:3 * H])
        h_new = (1.0 - i) * n + i * h
        h = h_new * mt + h * (1.0 - mt)
    return h


def make_params(key, input_size, hidden_size):
    """Fused parameters (nn.Linear weights are (out,in); we store them
    pre-transposed and concatenated along the output dim in r|i|n order)."""
    ks = jax.random.split(key, 3)
    si = 1.0 / jnp.sqrt(input_size)
    sh = 1.0 / jnp.sqrt(hidden_size)
    return {
        "W_ih": jax.random.uniform(ks[0], (input_size, 3 * hidden_size),
                                   jnp.float32, -si, si),
        "b_ih": jax.random.uniform(ks[1], (1, 3 * hidden_size),
                                   jnp.float32, -si, si),
        "W_hh": jax.random.uniform(ks[2], (hidden_size, 3 * hidden_size),
                                   jnp.float32, -sh, sh),
    }


if __name__ == "__main__":
    B, S, I, H = 2, 8, 16, 32
    key = jax.random.PRNGKey(0)
    kx, km, kp = jax.random.split(key, 3)

    x = jax.random.normal(kx, (B, S, I), jnp.float32)
    # float mask in {0,1}, shape (batch, seq) — PyTorch transposes internally
    mask = (jax.random.uniform(km, (B, S)) > 0.2).astype(jnp.float32)
    params = make_params(kp, I, H)

    hx = bayesian_gru_forward(x, mask, params)
    hx = jax.block_until_ready(hx)

    hx_ref = bayesian_gru_reference(x, mask, params)
    assert hx.shape == (B, H)
    assert jnp.allclose(hx, hx_ref, atol=1e-4, rtol=1e-4), "mismatch vs reference"

    print("KERNEL_OK")
</pallas_src>

<mosaic_0001>
module attributes {stable_mosaic.version = 11 : i64} {
  func.func @_gru_recurrence_kernel(%arg0: i32, %arg1: memref<8x8x96xf32, #tpu.memory_space<vmem>>, %arg2: memref<8x8x1xf32, #tpu.memory_space<vmem>>, %arg3: memref<32x96xf32, #tpu.memory_space<vmem>>, %arg4: memref<8x32xf32, #tpu.memory_space<vmem>>) attributes {dimension_semantics = [#tpu.dimension_semantics<arbitrary>], iteration_bounds = array<i64: 1>, scalar_prefetch = 0 : i64, scratch_operands = 0 : i64, tpu.core_type = #tpu.core_type<tc>, window_params = [{transform_indices = @transform_0, window_bounds = array<i64: 8, 8, 96>}, {transform_indices = @transform_1, window_bounds = array<i64: 8, 8, 1>}, {pipeline_mode = #tpu.pipeline_mode<synchronous>, transform_indices = @transform_2, window_bounds = array<i64: 32, 96>}, {pipeline_mode = #tpu.pipeline_mode<synchronous>, transform_indices = @transform_3, window_bounds = array<i64: 8, 32>}]} {
    %c0_i32 = arith.constant 0 : i32
    %0 = arith.cmpi eq, %arg0, %c0_i32 : i32
    %1 = arith.extui %0 : i1 to i32
    %c0_i32_0 = arith.constant 0 : i32
    %2 = arith.cmpi ne, %1, %c0_i32_0 : i32
    scf.if %2 {
      %cst_78 = arith.constant 0.000000e+00 : f32
      %326 = vector.broadcast %cst_78 : f32 to vector<8x32xf32>
      %c0_79 = arith.constant 0 : index
      %c0_80 = arith.constant 0 : index
      %327 = vector.load %arg4[%c0_79, %c0_80] : memref<8x32xf32, #tpu.memory_space<vmem>>, vector<8x32xf32>
      tpu.vector_store %arg4[%c0_79, %c0_80], %326 {strides = array<i32>} : memref<8x32xf32, #tpu.memory_space<vmem>>, vector<8x32xf32>,
    } else {
    }
    %c0 = arith.constant 0 : index
    %c0_1 = arith.constant 0 : index
    %3 = vector.load %arg3[%c0, %c0_1] : memref<32x96xf32, #tpu.memory_space<vmem>>, vector<32x96xf32>
    %c0_2 = arith.constant 0 : index
    %c0_3 = arith.constant 0 : index
    %4 = vector.load %arg4[%c0_2, %c0_3] : memref<8x32xf32, #tpu.memory_space<vmem>>, vector<8x32xf32>
    %c0_i32_4 = arith.constant 0 : i32
    %5 = arith.index_cast %c0_i32_4 : i32 to index
    %c0_5 = arith.constant 0 : index
    %c0_6 = arith.constant 0 : index
    %6 = vector.load %arg1[%5, %c0_5, %c0_6] : memref<8x8x96xf32, #tpu.memory_space<vmem>>, vector<1x8x96xf32>
    %7 = vector.shape_cast %6 : vector<1x8x96xf32> to vector<8x96xf32>
    %8 = arith.index_cast %c0_i32_4 : i32 to index
    %c0_7 = arith.constant 0 : index
    %c0_8 = arith.constant 0 : index
    %9 = vector.load %arg2[%8, %c0_7, %c0_8] : memref<8x8x1xf32, #tpu.memory_space<vmem>>, vector<1x8x1xf32>
    %10 = vector.shape_cast %9 : vector<1x8x1xf32> to vector<8x1xf32>
    %cst = arith.constant dense<0.000000e+00> : vector<8x96xf32>
    %11 = tpu.matmul %4, %3, %cst {dimension_numbers = #tpu.dot_dimension_numbers<[1], [0], [0], [1], [0, 0, 1, 1], [], []>} : vector<8x32xf32>, vector<32x96xf32>, vector<8x96xf32> -> vector<8x96xf32>
    %12 = vector.extract_strided_slice %7 {offsets = [0, 0], sizes = [8, 32], strides = [1, 1]} : vector<8x96xf32> to vector<8x32xf32>
    %13 = vector.extract_strided_slice %11 {offsets = [0, 0], sizes = [8, 32], strides = [1, 1]} : vector<8x96xf32> to vector<8x32xf32>
    %14 = arith.addf %12, %13 : vector<8x32xf32>
    %15 = arith.negf %14 : vector<8x32xf32>
    %16 = math.exp %15 : vector<8x32xf32>
    %cst_9 = arith.constant 1.000000e+00 : f32
    %17 = vector.broadcast %cst_9 : f32 to vector<8x32xf32>
    %18 = arith.addf %17, %16 : vector<8x32xf32>
    %19 = arith.divf %17, %18 : vector<8x32xf32>
    %20 = vector.extract_strided_slice %7 {offsets = [0, 32], sizes = [8, 32], strides = [1, 1]} : vector<8x96xf32> to vector<8x32xf32>
    %21 = vector.extract_strided_slice %11 {offsets = [0, 32], sizes = [8, 32], strides = [1, 1]} : vector<8x96xf32> to vector<8x32xf32>
    %22 = arith.addf %20, %21 : vector<8x32xf32>
    %23 = arith.negf %22 : vector<8x32xf32>
    %24 = math.exp %23 : vector<8x32xf32>
    %cst_10 = arith.constant 1.000000e+00 : f32
    %25 = vector.broadcast %cst_10 : f32 to vector<8x32xf32>
    %26 = arith.addf %25, %24 : vector<8x32xf32>
    %27 = arith.divf %25, %26 : vector<8x32xf32>
    %28 = vector.extract_strided_slice %7 {offsets = [0, 64], sizes = [8, 32], strides = [1, 1]} : vector<8x96xf32> to vector<8x32xf32>
    %29 = vector.extract_strided_slice %11 {offsets = [0, 64], sizes = [8, 32], strides = [1, 1]} : vector<8x96xf32> to vector<8x32xf32>
    %30 = arith.mulf %19, %29 : vector<8x32xf32>
    %31 = arith.addf %28, %30 : vector<8x32xf32>
    %32 = math.tanh %31 : vector<8x32xf32>
    %cst_11 = arith.constant 1.000000e+00 : f32
    %33 = vector.broadcast %cst_11 : f32 to vector<8x32xf32>
    %34 = arith.subf %33, %27 : vector<8x32xf32>
    %35 = arith.mulf %34, %32 : vector<8x32xf32>
    %36 = arith.mulf %27, %4 : vector<8x32xf32>
    %37 = arith.addf %35, %36 : vector<8x32xf32>
    %38 = vector.broadcast %10 : vector<8x1xf32> to vector<8x32xf32>
    %39 = arith.mulf %37, %38 : vector<8x32xf32>
    %cst_12 = arith.constant 1.000000e+00 : f32
    %40 = vector.broadcast %cst_12 : f32 to vector<8x1xf32>
    %41 = arith.subf %40, %10 : vector<8x1xf32>
    %42 = vector.broadcast %41 : vector<8x1xf32> to vector<8x32xf32>
    %43 = arith.mulf %4, %42 : vector<8x32xf32>
    %44 = arith.addf %39, %43 : vector<8x32xf32>
    %c1_i32 = arith.constant 1 : i32
    %45 = arith.index_cast %c1_i32 : i32 to index
    %c0_13 = arith.constant 0 : index
    %c0_14 = arith.constant 0 : index
    %46 = vector.load %arg1[%45, %c0_13, %c0_14] : memref<8x8x96xf32, #tpu.memory_space<vmem>>, vector<1x8x96xf32>
    %47 = vector.shape_cast %46 : vector<1x8x96xf32> to vector<8x96xf32>
    %48 = arith.index_cast %c1_i32 : i32 to index
    %c0_15 = arith.constant 0 : index
    %c0_16 = arith.constant 0 : index
    %49 = vector.load %arg2[%48, %c0_15, %c0_16] : memref<8x8x1xf32, #tpu.memory_space<vmem>>, vector<1x8x1xf32>
    %50 = vector.shape_cast %49 : vector<1x8x1xf32> to vector<8x1xf32>
    %cst_17 = arith.constant dense<0.000000e+00> : vector<8x96xf32>
    %51 = tpu.matmul %44, %3, %cst_17 {dimension_numbers = #tpu.dot_dimension_numbers<[1], [0], [0], [1], [0, 0, 1, 1], [], []>} : vector<8x32xf32>, vector<32x96xf32>, vector<8x96xf32> -> vector<8x96xf32>
    %52 = vector.extract_strided_slice %47 {offsets = [0, 0], sizes = [8, 32], strides = [1, 1]} : vector<8x96xf32> to vector<8x32xf32>
    %53 = vector.extract_strided_slice %51 {offsets = [0, 0], sizes = [8, 32], strides = [1, 1]} : vector<8x96xf32> to vector<8x32xf32>
    %54 = arith.addf %52, %53 : vector<8x32xf32>
    %55 = arith.negf %54 : vector<8x32xf32>
    %56 = math.exp %55 : vector<8x32xf32>
    %cst_18 = arith.constant 1.000000e+00 : f32
    %57 = vector.broadcast %cst_18 : f32 to vector<8x32xf32>
    %58 = arith.addf %57, %56 : vector<8x32xf32>
    %59 = arith.divf %57, %58 : vector<8x32xf32>
    %60 = vector.extract_strided_slice %47 {offsets = [0, 32], sizes = [8, 32], strides = [1, 1]} : vector<8x96xf32> to vector<8x32xf32>
    %61 = vector.extract_strided_slice %51 {offsets = [0, 32], sizes = [8, 32], strides = [1, 1]} : vector<8x96xf32> to vector<8x32xf32>
    %62 = arith.addf %60, %61 : vector<8x32xf32>
    %63 = arith.negf %62 : vector<8x32xf32>
    %64 = math.exp %63 : vector<8x32xf32>
    %cst_19 = arith.constant 1.000000e+00 : f32
    %65 = vector.broadcast %cst_19 : f32 to vector<8x32xf32>
    %66 = arith.addf %65, %64 : vector<8x32xf32>
    %67 = arith.divf %65, %66 : vector<8x32xf32>
    %68 = vector.extract_strided_slice %47 {offsets = [0, 64], sizes = [8, 32], strides = [1, 1]} : vector<8x96xf32> to vector<8x32xf32>
    %69 = vector.extract_strided_slice %51 {offsets = [0, 64], sizes = [8, 32], strides = [1, 1]} : vector<8x96xf32> to vector<8x32xf32>
    %70 = arith.mulf %59, %69 : vector<8x32xf32>
    %71 = arith.addf %68, %70 : vector<8x32xf32>
    %72 = math.tanh %71 : vector<8x32xf32>
    %cst_20 = arith.constant 1.000000e+00 : f32
    %73 = vector.broadcast %cst_20 : f32 to vector<8x32xf32>
    %74 = arith.subf %73, %67 : vector<8x32xf32>
    %75 = arith.mulf %74, %72 : vector<8x32xf32>
    %76 = arith.mulf %67, %44 : vector<8x32xf32>
    %77 = arith.addf %75, %76 : vector<8x32xf32>
    %78 = vector.broadcast %50 : vector<8x1xf32> to vector<8x32xf32>
    %79 = arith.mulf %77, %78 : vector<8x32xf32>
    %cst_21 = arith.constant 1.000000e+00 : f32
    %80 = vector.broadcast %cst_21 : f32 to vector<8x1xf32>
    %81 = arith.subf %80, %50 : vector<8x1xf32>
    %82 = vector.broadcast %81 : vector<8x1xf32> to vector<8x32xf32>
    %83 = arith.mulf %44, %82 : vector<8x32xf32>
    %84 = arith.addf %79, %83 : vector<8x32xf32>
    %c2_i32 = arith.constant 2 : i32
    %85 = arith.index_cast %c2_i32 : i32 to index
    %c0_22 = arith.constant 0 : index
    %c0_23 = arith.constant 0 : index
    %86 = vector.load %arg1[%85, %c0_22, %c0_23] : memref<8x8x96xf32, #tpu.memory_space<vmem>>, vector<1x8x96xf32>
    %87 = vector.shape_cast %86 : vector<1x8x96xf32> to vector<8x96xf32>
    %88 = arith.index_cast %c2_i32 : i32 to index
    %c0_24 = arith.constant 0 : index
    %c0_25 = arith.constant 0 : index
    %89 = vector.load %arg2[%88, %c0_24, %c0_25] : memref<8x8x1xf32, #tpu.memory_space<vmem>>, vector<1x8x1xf32>
    %90 = vector.shape_cast %89 : vector<1x8x1xf32> to vector<8x1xf32>
    %cst_26 = arith.constant dense<0.000000e+00> : vector<8x96xf32>
    %91 = tpu.matmul %84, %3, %cst_26 {dimension_numbers = #tpu.dot_dimension_numbers<[1], [0], [0], [1], [0, 0, 1, 1], [], []>} : vector<8x32xf32>, vector<32x96xf32>, vector<8x96xf32> -> vector<8x96xf32>
    %92 = vector.extract_strided_slice %87 {offsets = [0, 0], sizes = [8, 32], strides = [1, 1]} : vector<8x96xf32> to vector<8x32xf32>
    %93 = vector.extract_strided_slice %91 {offsets = [0, 0], sizes = [8, 32], strides = [1, 1]} : vector<8x96xf32> to vector<8x32xf32>
    %94 = arith.addf %92, %93 : vector<8x32xf32>
    %95 = arith.negf %94 : vector<8x32xf32>
    %96 = math.exp %95 : vector<8x32xf32>
    %cst_27 = arith.constant 1.000000e+00 : f32
    %97 = vector.broadcast %cst_27 : f32 to vector<8x32xf32>
    %98 = arith.addf %97, %96 : vector<8x32xf32>
    %99 = arith.divf %97, %98 : vector<8x32xf32>
    %100 = vector.extract_strided_slice %87 {offsets = [0, 32], sizes = [8, 32], strides = [1, 1]} : vector<8x96xf32> to vector<8x32xf32>
    %101 = vector.extract_strided_slice %91 {offsets = [0, 32], sizes = [8, 32], strides = [1, 1]} : vector<8x96xf32> to vector<8x32xf32>
    %102 = arith.addf %100, %101 : vector<8x32xf32>
    %103 = arith.negf %102 : vector<8x32xf32>
    %104 = math.exp %103 : vector<8x32xf32>
    %cst_28 = arith.constant 1.000000e+00 : f32
    %105 = vector.broadcast %cst_28 : f32 to vector<8x32xf32>
    %106 = arith.addf %105, %104 : vector<8x32xf32>
    %107 = arith.divf %105, %106 : vector<8x32xf32>
    %108 = vector.extract_strided_slice %87 {offsets = [0, 64], sizes = [8, 32], strides = [1, 1]} : vector<8x96xf32> to vector<8x32xf32>
    %109 = vector.extract_strided_slice %91 {offsets = [0, 64], sizes = [8, 32], strides = [1, 1]} : vector<8x96xf32> to vector<8x32xf32>
    %110 = arith.mulf %99, %109 : vector<8x32xf32>
    %111 = arith.addf %108, %110 : vector<8x32xf32>
    %112 = math.tanh %111 : vector<8x32xf32>
    %cst_29 = arith.constant 1.000000e+00 : f32
    %113 = vector.broadcast %cst_29 : f32 to vector<8x32xf32>
    %114 = arith.subf %113, %107 : vector<8x32xf32>
    %115 = arith.mulf %114, %112 : vector<8x32xf32>
    %116 = arith.mulf %107, %84 : vector<8x32xf32>
    %117 = arith.addf %115, %116 : vector<8x32xf32>
    %118 = vector.broadcast %90 : vector<8x1xf32> to vector<8x32xf32>
    %119 = arith.mulf %117, %118 : vector<8x32xf32>
    %cst_30 = arith.constant 1.000000e+00 : f32
    %120 = vector.broadcast %cst_30 : f32 to vector<8x1xf32>
    %121 = arith.subf %120, %90 : vector<8x1xf32>
    %122 = vector.broadcast %121 : vector<8x1xf32> to vector<8x32xf32>
    %123 = arith.mulf %84, %122 : vector<8x32xf32>
    %124 = arith.addf %119, %123 : vector<8x32xf32>
    %c3_i32 = arith.constant 3 : i32
    %125 = arith.index_cast %c3_i32 : i32 to index
    %c0_31 = arith.constant 0 : index
    %c0_32 = arith.constant 0 : index
    %126 = vector.load %arg1[%125, %c0_31, %c0_32] : memref<8x8x96xf32, #tpu.memory_space<vmem>>, vector<1x8x96xf32>
    %127 = vector.shape_cast %126 : vector<1x8x96xf32> to vector<8x96xf32>
    %128 = arith.index_cast %c3_i32 : i32 to index
    %c0_33 = arith.constant 0 : index
    %c0_34 = arith.constant 0 : index
    %129 = vector.load %arg2[%128, %c0_33, %c0_34] : memref<8x8x1xf32, #tpu.memory_space<vmem>>, vector<1x8x1xf32>
    %130 = vector.shape_cast %129 : vector<1x8x1xf32> to vector<8x1xf32>
    %cst_35 = arith.constant dense<0.000000e+00> : vector<8x96xf32>
    %131 = tpu.matmul %124, %3, %cst_35 {dimension_numbers = #tpu.dot_dimension_numbers<[1], [0], [0], [1], [0, 0, 1, 1], [], []>} : vector<8x32xf32>, vector<32x96xf32>, vector<8x96xf32> -> vector<8x96xf32>
    %132 = vector.extract_strided_slice %127 {offsets = [0, 0], sizes = [8, 32], strides = [1, 1]} : vector<8x96xf32> to vector<8x32xf32>
    %133 = vector.extract_strided_slice %131 {offsets = [0, 0], sizes = [8, 32], strides = [1, 1]} : vector<8x96xf32> to vector<8x32xf32>
    %134 = arith.addf %132, %133 : vector<8x32xf32>
    %135 = arith.negf %134 : vector<8x32xf32>
    %136 = math.exp %135 : vector<8x32xf32>
    %cst_36 = arith.constant 1.000000e+00 : f32
    %137 = vector.broadcast %cst_36 : f32 to vector<8x32xf32>
    %138 = arith.addf %137, %136 : vector<8x32xf32>
    %139 = arith.divf %137, %138 : vector<8x32xf32>
    %140 = vector.extract_strided_slice %127 {offsets = [0, 32], sizes = [8, 32], strides = [1, 1]} : vector<8x96xf32> to vector<8x32xf32>
    %141 = vector.extract_strided_slice %131 {offsets = [0, 32], sizes = [8, 32], strides = [1, 1]} : vector<8x96xf32> to vector<8x32xf32>
    %142 = arith.addf %140, %141 : vector<8x32xf32>
    %143 = arith.negf %142 : vector<8x32xf32>
    %144 = math.exp %143 : vector<8x32xf32>
    %cst_37 = arith.constant 1.000000e+00 : f32
    %145 = vector.broadcast %cst_37 : f32 to vector<8x32xf32>
    %146 = arith.addf %145, %144 : vector<8x32xf32>
    %147 = arith.divf %145, %146 : vector<8x32xf32>
    %148 = vector.extract_strided_slice %127 {offsets = [0, 64], sizes = [8, 32], strides = [1, 1]} : vector<8x96xf32> to vector<8x32xf32>
    %149 = vector.extract_strided_slice %131 {offsets = [0, 64], sizes = [8, 32], strides = [1, 1]} : vector<8x96xf32> to vector<8x32xf32>
    %150 = arith.mulf %139, %149 : vector<8x32xf32>
    %151 = arith.addf %148, %150 : vector<8x32xf32>
    %152 = math.tanh %151 : vector<8x32xf32>
    %cst_38 = arith.constant 1.000000e+00 : f32
    %153 = vector.broadcast %cst_38 : f32 to vector<8x32xf32>
    %154 = arith.subf %153, %147 : vector<8x32xf32>
    %155 = arith.mulf %154, %152 : vector<8x32xf32>
    %156 = arith.mulf %147, %124 : vector<8x32xf32>
    %157 = arith.addf %155, %156 : vector<8x32xf32>
    %158 = vector.broadcast %130 : vector<8x1xf32> to vector<8x32xf32>
    %159 = arith.mulf %157, %158 : vector<8x32xf32>
    %cst_39 = arith.constant 1.000000e+00 : f32
    %160 = vector.broadcast %cst_39 : f32 to vector<8x1xf32>
    %161 = arith.subf %160, %130 : vector<8x1xf32>
    %162 = vector.broadcast %161 : vector<8x1xf32> to vector<8x32xf32>
    %163 = arith.mulf %124, %162 : vector<8x32xf32>
    %164 = arith.addf %159, %163 : vector<8x32xf32>
    %c4_i32 = arith.constant 4 : i32
    %165 = arith.index_cast %c4_i32 : i32 to index
    %c0_40 = arith.constant 0 : index
    %c0_41 = arith.constant 0 : index
    %166 = vector.load %arg1[%165, %c0_40, %c0_41] : memref<8x8x96xf32, #tpu.memory_space<vmem>>, vector<1x8x96xf32>
    %167 = vector.shape_cast %166 : vector<1x8x96xf32> to vector<8x96xf32>
    %168 = arith.index_cast %c4_i32 : i32 to index
    %c0_42 = arith.constant 0 : index
    %c0_43 = arith.constant 0 : index
    %169 = vector.load %arg2[%168, %c0_42, %c0_43] : memref<8x8x1xf32, #tpu.memory_space<vmem>>, vector<1x8x1xf32>
    %170 = vector.shape_cast %169 : vector<1x8x1xf32> to vector<8x1xf32>
    %cst_44 = arith.constant dense<0.000000e+00> : vector<8x96xf32>
    %171 = tpu.matmul %164, %3, %cst_44 {dimension_numbers = #tpu.dot_dimension_numbers<[1], [0], [0], [1], [0, 0, 1, 1], [], []>} : vector<8x32xf32>, vector<32x96xf32>, vector<8x96xf32> -> vector<8x96xf32>
    %172 = vector.extract_strided_slice %167 {offsets = [0, 0], sizes = [8, 32], strides = [1, 1]} : vector<8x96xf32> to vector<8x32xf32>
    %173 = vector.extract_strided_slice %171 {offsets = [0, 0], sizes = [8, 32], strides = [1, 1]} : vector<8x96xf32> to vector<8x32xf32>
    %174 = arith.addf %172, %173 : vector<8x32xf32>
    %175 = arith.negf %174 : vector<8x32xf32>
    %176 = math.exp %175 : vector<8x32xf32>
    %cst_45 = arith.constant 1.000000e+00 : f32
    %177 = vector.broadcast %cst_45 : f32 to vector<8x32xf32>
    %178 = arith.addf %177, %176 : vector<8x32xf32>
    %179 = arith.divf %177, %178 : vector<8x32xf32>
    %180 = vector.extract_strided_slice %167 {offsets = [0, 32], sizes = [8, 32], strides = [1, 1]} : vector<8x96xf32> to vector<8x32xf32>
    %181 = vector.extract_strided_slice %171 {offsets = [0, 32], sizes = [8, 32], strides = [1, 1]} : vector<8x96xf32> to vector<8x32xf32>
    %182 = arith.addf %180, %181 : vector<8x32xf32>
    %183 = arith.negf %182 : vector<8x32xf32>
    %184 = math.exp %183 : vector<8x32xf32>
    %cst_46 = arith.constant 1.000000e+00 : f32
    %185 = vector.broadcast %cst_46 : f32 to vector<8x32xf32>
    %186 = arith.addf %185, %184 : vector<8x32xf32>
    %187 = arith.divf %185, %186 : vector<8x32xf32>
    %188 = vector.extract_strided_slice %167 {offsets = [0, 64], sizes = [8, 32], strides = [1, 1]} : vector<8x96xf32> to vector<8x32xf32>
    %189 = vector.extract_strided_slice %171 {offsets = [0, 64], sizes = [8, 32], strides = [1, 1]} : vector<8x96xf32> to vector<8x32xf32>
    %190 = arith.mulf %179, %189 : vector<8x32xf32>
    %191 = arith.addf %188, %190 : vector<8x32xf32>
    %192 = math.tanh %191 : vector<8x32xf32>
    %cst_47 = arith.constant 1.000000e+00 : f32
    %193 = vector.broadcast %cst_47 : f32 to vector<8x32xf32>
    %194 = arith.subf %193, %187 : vector<8x32xf32>
    %195 = arith.mulf %194, %192 : vector<8x32xf32>
    %196 = arith.mulf %187, %164 : vector<8x32xf32>
    %197 = arith.addf %195, %196 : vector<8x32xf32>
    %198 = vector.broadcast %170 : vector<8x1xf32> to vector<8x32xf32>
    %199 = arith.mulf %197, %198 : vector<8x32xf32>
    %cst_48 = arith.constant 1.000000e+00 : f32
    %200 = vector.broadcast %cst_48 : f32 to vector<8x1xf32>
    %201 = arith.subf %200, %170 : vector<8x1xf32>
    %202 = vector.broadcast %201 : vector<8x1xf32> to vector<8x32xf32>
    %203 = arith.mulf %164, %202 : vector<8x32xf32>
    %204 = arith.addf %199, %203 : vector<8x32xf32>
    %c5_i32 = arith.constant 5 : i32
    %205 = arith.index_cast %c5_i32 : i32 to index
    %c0_49 = arith.constant 0 : index
    %c0_50 = arith.constant 0 : index
    %206 = vector.load %arg1[%205, %c0_49, %c0_50] : memref<8x8x96xf32, #tpu.memory_space<vmem>>, vector<1x8x96xf32>
    %207 = vector.shape_cast %206 : vector<1x8x96xf32> to vector<8x96xf32>
    %208 = arith.index_cast %c5_i32 : i32 to index
    %c0_51 = arith.constant 0 : index
    %c0_52 = arith.constant 0 : index
    %209 = vector.load %arg2[%208, %c0_51, %c0_52] : memref<8x8x1xf32, #tpu.memory_space<vmem>>, vector<1x8x1xf32>
    %210 = vector.shape_cast %209 : vector<1x8x1xf32> to vector<8x1xf32>
    %cst_53 = arith.constant dense<0.000000e+00> : vector<8x96xf32>
    %211 = tpu.matmul %204, %3, %cst_53 {dimension_numbers = #tpu.dot_dimension_numbers<[1], [0], [0], [1], [0, 0, 1, 1], [], []>} : vector<8x32xf32>, vector<32x96xf32>, vector<8x96xf32> -> vector<8x96xf32>
    %212 = vector.extract_strided_slice %207 {offsets = [0, 0], sizes = [8, 32], strides = [1, 1]} : vector<8x96xf32> to vector<8x32xf32>
    %213 = vector.extract_strided_slice %211 {offsets = [0, 0], sizes = [8, 32], strides = [1, 1]} : vector<8x96xf32> to vector<8x32xf32>
    %214 = arith.addf %212, %213 : vector<8x32xf32>
    %215 = arith.negf %214 : vector<8x32xf32>
    %216 = math.exp %215 : vector<8x32xf32>
    %cst_54 = arith.constant 1.000000e+00 : f32
    %217 = vector.broadcast %cst_54 : f32 to vector<8x32xf32>
    %218 = arith.addf %217, %216 : vector<8x32xf32>
    %219 = arith.divf %217, %218 : vector<8x32xf32>
    %220 = vector.extract_strided_slice %207 {offsets = [0, 32], sizes = [8, 32], strides = [1, 1]} : vector<8x96xf32> to vector<8x32xf32>
    %221 = vector.extract_strided_slice %211 {offsets = [0, 32], sizes = [8, 32], strides = [1, 1]} : vector<8x96xf32> to vector<8x32xf32>
    %222 = arith.addf %220, %221 : vector<8x32xf32>
    %223 = arith.negf %222 : vector<8x32xf32>
    %224 = math.exp %223 : vector<8x32xf32>
    %cst_55 = arith.constant 1.000000e+00 : f32
    %225 = vector.broadcast %cst_55 : f32 to vector<8x32xf32>
    %226 = arith.addf %225, %224 : vector<8x32xf32>
    %227 = arith.divf %225, %226 : vector<8x32xf32>
    %228 = vector.extract_strided_slice %207 {offsets = [0, 64], sizes = [8, 32], strides = [1, 1]} : vector<8x96xf32> to vector<8x32xf32>
    %229 = vector.extract_strided_slice %211 {offsets = [0, 64], sizes = [8, 32], strides = [1, 1]} : vector<8x96xf32> to vector<8x32xf32>
    %230 = arith.mulf %219, %229 : vector<8x32xf32>
    %231 = arith.addf %228, %230 : vector<8x32xf32>
    %232 = math.tanh %231 : vector<8x32xf32>
    %cst_56 = arith.constant 1.000000e+00 : f32
    %233 = vector.broadcast %cst_56 : f32 to vector<8x32xf32>
    %234 = arith.subf %233, %227 : vector<8x32xf32>
    %235 = arith.mulf %234, %232 : vector<8x32xf32>
    %236 = arith.mulf %227, %204 : vector<8x32xf32>
    %237 = arith.addf %235, %236 : vector<8x32xf32>
    %238 = vector.broadcast %210 : vector<8x1xf32> to vector<8x32xf32>
    %239 = arith.mulf %237, %238 : vector<8x32xf32>
    %cst_57 = arith.constant 1.000000e+00 : f32
    %240 = vector.broadcast %cst_57 : f32 to vector<8x1xf32>
    %241 = arith.subf %240, %210 : vector<8x1xf32>
    %242 = vector.broadcast %241 : vector<8x1xf32> to vector<8x32xf32>
    %243 = arith.mulf %204, %242 : vector<8x32xf32>
    %244 = arith.addf %239, %243 : vector<8x32xf32>
    %c6_i32 = arith.constant 6 : i32
    %245 = arith.index_cast %c6_i32 : i32 to index
    %c0_58 = arith.constant 0 : index
    %c0_59 = arith.constant 0 : index
    %246 = vector.load %arg1[%245, %c0_58, %c0_59] : memref<8x8x96xf32, #tpu.memory_space<vmem>>, vector<1x8x96xf32>
    %247 = vector.shape_cast %246 : vector<1x8x96xf32> to vector<8x96xf32>
    %248 = arith.index_cast %c6_i32 : i32 to index
    %c0_60 = arith.constant 0 : index
    %c0_61 = arith.constant 0 : index
    %249 = vector.load %arg2[%248, %c0_60, %c0_61] : memref<8x8x1xf32, #tpu.memory_space<vmem>>, vector<1x8x1xf32>
    %250 = vector.shape_cast %249 : vector<1x8x1xf32> to vector<8x1xf32>
    %cst_62 = arith.constant dense<0.000000e+00> : vector<8x96xf32>
    %251 = tpu.matmul %244, %3, %cst_62 {dimension_numbers = #tpu.dot_dimension_numbers<[1], [0], [0], [1], [0, 0, 1, 1], [], []>} : vector<8x32xf32>, vector<32x96xf32>, vector<8x96xf32> -> vector<8x96xf32>
    %252 = vector.extract_strided_slice %247 {offsets = [0, 0], sizes = [8, 32], strides = [1, 1]} : vector<8x96xf32> to vector<8x32xf32>
    %253 = vector.extract_strided_slice %251 {offsets = [0, 0], sizes = [8, 32], strides = [1, 1]} : vector<8x96xf32> to vector<8x32xf32>
    %254 = arith.addf %252, %253 : vector<8x32xf32>
    %255 = arith.negf %254 : vector<8x32xf32>
    %256 = math.exp %255 : vector<8x32xf32>
    %cst_63 = arith.constant 1.000000e+00 : f32
    %257 = vector.broadcast %cst_63 : f32 to vector<8x32xf32>
    %258 = arith.addf %257, %256 : vector<8x32xf32>
    %259 = arith.divf %257, %258 : vector<8x32xf32>
    %260 = vector.extract_strided_slice %247 {offsets = [0, 32], sizes = [8, 32], strides = [1, 1]} : vector<8x96xf32> to vector<8x32xf32>
    %261 = vector.extract_strided_slice %251 {offsets = [0, 32], sizes = [8, 32], strides = [1, 1]} : vector<8x96xf32> to vector<8x32xf32>
    %262 = arith.addf %260, %261 : vector<8x32xf32>
    %263 = arith.negf %262 : vector<8x32xf32>
    %264 = math.exp %263 : vector<8x32xf32>
    %cst_64 = arith.constant 1.000000e+00 : f32
    %265 = vector.broadcast %cst_64 : f32 to vector<8x32xf32>
    %266 = arith.addf %265, %264 : vector<8x32xf32>
    %267 = arith.divf %265, %266 : vector<8x32xf32>
    %268 = vector.extract_strided_slice %247 {offsets = [0, 64], sizes = [8, 32], strides = [1, 1]} : vector<8x96xf32> to vector<8x32xf32>
    %269 = vector.extract_strided_slice %251 {offsets = [0, 64], sizes = [8, 32], strides = [1, 1]} : vector<8x96xf32> to vector<8x32xf32>
    %270 = arith.mulf %259, %269 : vector<8x32xf32>
    %271 = arith.addf %268, %270 : vector<8x32xf32>
    %272 = math.tanh %271 : vector<8x32xf32>
    %cst_65 = arith.constant 1.000000e+00 : f32
    %273 = vector.broadcast %cst_65 : f32 to vector<8x32xf32>
    %274 = arith.subf %273, %267 : vector<8x32xf32>
    %275 = arith.mulf %274, %272 : vector<8x32xf32>
    %276 = arith.mulf %267, %244 : vector<8x32xf32>
    %277 = arith.addf %275, %276 : vector<8x32xf32>
    %278 = vector.broadcast %250 : vector<8x1xf32> to vector<8x32xf32>
    %279 = arith.mulf %277, %278 : vector<8x32xf32>
    %cst_66 = arith.constant 1.000000e+00 : f32
    %280 = vector.broadcast %cst_66 : f32 to vector<8x1xf32>
    %281 = arith.subf %280, %250 : vector<8x1xf32>
    %282 = vector.broadcast %281 : vector<8x1xf32> to vector<8x32xf32>
    %283 = arith.mulf %244, %282 : vector<8x32xf32>
    %284 = arith.addf %279, %283 : vector<8x32xf32>
    %c7_i32 = arith.constant 7 : i32
    %285 = arith.index_cast %c7_i32 : i32 to index
    %c0_67 = arith.constant 0 : index
    %c0_68 = arith.constant 0 : index
    %286 = vector.load %arg1[%285, %c0_67, %c0_68] : memref<8x8x96xf32, #tpu.memory_space<vmem>>, vector<1x8x96xf32>
    %287 = vector.shape_cast %286 : vector<1x8x96xf32> to vector<8x96xf32>
    %288 = arith.index_cast %c7_i32 : i32 to index
    %c0_69 = arith.constant 0 : index
    %c0_70 = arith.constant 0 : index
    %289 = vector.load %arg2[%288, %c0_69, %c0_70] : memref<8x8x1xf32, #tpu.memory_space<vmem>>, vector<1x8x1xf32>
    %290 = vector.shape_cast %289 : vector<1x8x1xf32> to vector<8x1xf32>
    %cst_71 = arith.constant dense<0.000000e+00> : vector<8x96xf32>
    %291 = tpu.matmul %284, %3, %cst_71 {dimension_numbers = #tpu.dot_dimension_numbers<[1], [0], [0], [1], [0, 0, 1, 1], [], []>} : vector<8x32xf32>, vector<32x96xf32>, vector<8x96xf32> -> vector<8x96xf32>
    %292 = vector.extract_strided_slice %287 {offsets = [0, 0], sizes = [8, 32], strides = [1, 1]} : vector<8x96xf32> to vector<8x32xf32>
    %293 = vector.extract_strided_slice %291 {offsets = [0, 0], sizes = [8, 32], strides = [1, 1]} : vector<8x96xf32> to vector<8x32xf32>
    %294 = arith.addf %292, %293 : vector<8x32xf32>
    %295 = arith.negf %294 : vector<8x32xf32>
    %296 = math.exp %295 : vector<8x32xf32>
    %cst_72 = arith.constant 1.000000e+00 : f32
    %297 = vector.broadcast %cst_72 : f32 to vector<8x32xf32>
    %298 = arith.addf %297, %296 : vector<8x32xf32>
    %299 = arith.divf %297, %298 : vector<8x32xf32>
    %300 = vector.extract_strided_slice %287 {offsets = [0, 32], sizes = [8, 32], strides = [1, 1]} : vector<8x96xf32> to vector<8x32xf32>
    %301 = vector.extract_strided_slice %291 {offsets = [0, 32], sizes = [8, 32], strides = [1, 1]} : vector<8x96xf32> to vector<8x32xf32>
    %302 = arith.addf %300, %301 : vector<8x32xf32>
    %303 = arith.negf %302 : vector<8x32xf32>
    %304 = math.exp %303 : vector<8x32xf32>
    %cst_73 = arith.constant 1.000000e+00 : f32
    %305 = vector.broadcast %cst_73 : f32 to vector<8x32xf32>
    %306 = arith.addf %305, %304 : vector<8x32xf32>
    %307 = arith.divf %305, %306 : vector<8x32xf32>
    %308 = vector.extract_strided_slice %287 {offsets = [0, 64], sizes = [8, 32], strides = [1, 1]} : vector<8x96xf32> to vector<8x32xf32>
    %309 = vector.extract_strided_slice %291 {offsets = [0, 64], sizes = [8, 32], strides = [1, 1]} : vector<8x96xf32> to vector<8x32xf32>
    %310 = arith.mulf %299, %309 : vector<8x32xf32>
    %311 = arith.addf %308, %310 : vector<8x32xf32>
    %312 = math.tanh %311 : vector<8x32xf32>
    %cst_74 = arith.constant 1.000000e+00 : f32
    %313 = vector.broadcast %cst_74 : f32 to vector<8x32xf32>
    %314 = arith.subf %313, %307 : vector<8x32xf32>
    %315 = arith.mulf %314, %312 : vector<8x32xf32>
    %316 = arith.mulf %307, %284 : vector<8x32xf32>
    %317 = arith.addf %315, %316 : vector<8x32xf32>
    %318 = vector.broadcast %290 : vector<8x1xf32> to vector<8x32xf32>
    %319 = arith.mulf %317, %318 : vector<8x32xf32>
    %cst_75 = arith.constant 1.000000e+00 : f32
    %320 = vector.broadcast %cst_75 : f32 to vector<8x1xf32>
    %321 = arith.subf %320, %290 : vector<8x1xf32>
    %322 = vector.broadcast %321 : vector<8x1xf32> to vector<8x32xf32>
    %323 = arith.mulf %284, %322 : vector<8x32xf32>
    %324 = arith.addf %319, %323 : vector<8x32xf32>
    %c8_i32 = arith.constant 8 : i32
    %c0_76 = arith.constant 0 : index
    %c0_77 = arith.constant 0 : index
    %325 = vector.load %arg4[%c0_76, %c0_77] : memref<8x32xf32, #tpu.memory_space<vmem>>, vector<8x32xf32>
    tpu.vector_store %arg4[%c0_76, %c0_77], %324 {strides = array<i32>} : memref<8x32xf32, #tpu.memory_space<vmem>>, vector<8x32xf32>,
    return
  }
  func.func @transform_0(%arg0: i32) -> (i32, i32, i32) {
    %c0_i32 = arith.constant 0 : i32
    %c0_i32_0 = arith.constant 0 : i32
    %c0_i32_1 = arith.constant 0 : i32
    return %arg0, %c0_i32, %c0_i32_0 : i32, i32, i32
  }
  func.func @transform_1(%arg0: i32) -> (i32, i32, i32) {
    %c0_i32 = arith.constant 0 : i32
    %c0_i32_0 = arith.constant 0 : i32
    %c0_i32_1 = arith.constant 0 : i32
    return %arg0, %c0_i32, %c0_i32_0 : i32, i32, i32
  }
  func.func @transform_2(%arg0: i32) -> (i32, i32) {
    %c0_i32 = arith.constant 0 : i32
    %c0_i32_0 = arith.constant 0 : i32
    %c0_i32_1 = arith.constant 0 : i32
    return %c0_i32, %c0_i32_0 : i32, i32
  }
  func.func @transform_3(%arg0: i32) -> (i32, i32) {
    %c0_i32 = arith.constant 0 : i32
    %c0_i32_0 = arith.constant 0 : i32
    %c0_i32_1 = arith.constant 0 : i32
    return %c0_i32, %c0_i32_0 : i32, i32
  }
}

</mosaic_0001>

<bundles_post_ra>
// kernel: tpu_custom_call.1
= control target key start
LH: loop header
LB: loop body
LE: loop exit
PB: predicated region body
PF: predicated region fallthrough
CT: control target
= control target key end

     0   :  { %8 = vsyncpa [#allocation3], 0  ;;  %s1585_s0 = inlined_call_operand.hbm [shape: f32[8,8,96], index: 0, kind: input, shape index: {}]   ;;  %s1586_s1 = inlined_call_operand.hbm [shape: f32[8,8,1], index: 1, kind: input, shape index: {}]   ;;  %s1587_s2 = inlined_call_operand.hbm [shape: f32[32,96], index: 2, kind: input, shape index: {}]   ;;  %s1588_s3 = inlined_call_operand.hbm [shape: f32[8,32], index: 3, kind: output, shape index: {}]  }
   0x1   :  { %9 = vsyncpa [#allocation6], 0 }
   0x2   :  { %10 = vsyncpa [#allocation4], 0  ;;  %s1393_s12 = smov [#allocation5]   ;;  %s1394_s14 = smov [#allocation2]  }
   0x3   :  { %s28_s13 = sshll.u32 %s1393_s12, 4  ;;  %s16_s15 = sshll.u32 %s1394_s14, 4  ;;  %s29_s13 = int_to_ptr.vmem [resolvable:$true] %s28_s13  ;;  %s1426_s15 = int_to_ptr.vmem [resolvable:$true] %s16_s15 }
   0x4   :  { %s1299_s18 = scalar_lea.hbm %s1586_s1, 1024 }
   0x5   :  { %p1300_p0 = scmp.ne.s32.totalorder %s1586_s1, %s1299_s18  ;;  %p1303_p1 = scmp.lt.u32.totalorder %s1299_s18, %s1586_s1 }
   0x7   :  { %p1305_p2 = pnand %p1303_p1, %p1300_p0 }
   0x9   :  { %1308 = shalt.err (!%p1305_p2)
}
   0xa   :  { %s1309_s23 = scalar_lea.vmem %s29_s13, 1024  ;;  %p1314_p4 = scmp.lt.s32.totalorder %s29_s13, %s29_s13 }
   0xb   :  { %p1310_p3 = scmp.ne.s32.totalorder %s29_s13, %s1309_s23  ;;  %p1315_p5 = scmp.lt.s32.totalorder %s1309_s23, %s1309_s23 }
   0xd   :  { %p1316_p6 = por %p1315_p5, %p1314_p4 }
   0xf   :  { %p1317_p7 = pnand %p1316_p6, %p1310_p3 }
  0x11   :  { %1320 = shalt.err (!%p1317_p7)
}
  0x12   :  { %s1395_s24 = smov 128   ;;  %s1396_s25 = smov 8  }
  0x13   :  { %34 = dma.hbm_to_vmem [thread:$0]  %s1586_s1, 1024, %s29_s13, [#allocation6], %s1395_s24, %s1395_s24, %s1396_s25  }
  0x14   :  { %s1321_s30 = scalar_lea.hbm %s1585_s0, 1024 }
  0x15   :  { %p1322_p8 = scmp.ne.s32.totalorder %s1585_s0, %s1321_s30  ;;  %p1325_p9 = scmp.lt.u32.totalorder %s1321_s30, %s1585_s0 }
  0x17   :  { %p1327_p10 = pnand %p1325_p9, %p1322_p8 }
  0x19   :  { %1330 = shalt.err (!%p1327_p10)
}
  0x1a   :  { %s1331_s8 = scalar_lea.vmem %s1426_s15, 1024  ;;  %p1336_p12 = scmp.lt.s32.totalorder %s1426_s15, %s1426_s15 }
  0x1b   :  { %p1332_p11 = scmp.ne.s32.totalorder %s1426_s15, %s1331_s8  ;;  %p1337_p13 = scmp.lt.s32.totalorder %s1331_s8, %s1331_s8 }
  0x1d   :  { %p1338_p0 = por %p1337_p13, %p1336_p12 }
  0x1f   :  { %p1339_p1 = pnand %p1338_p0, %p1332_p11 }
  0x21   :  { %1342 = shalt.err (!%p1339_p1)
}
  0x22   :  { %22 = dma.hbm_to_vmem [thread:$0]  %s1585_s0, 1024, %s1426_s15, [#allocation3], %s1395_s24, %s1395_s24, %s1396_s25  }
  0x23   :  { %s1397_s10 = smov [#allocation7]   ;;  %s1343_s14 = scalar_lea.hbm %s1587_s2, 512 }
  0x24   :  { %s40_s11 = sshll.u32 %s1397_s10, 4  ;;  %p1344_p2 = scmp.ne.s32.totalorder %s1587_s2, %s1343_s14  ;;  %s41_s11 = int_to_ptr.vmem [resolvable:$true] %s40_s11 }
  0x25   :  { %p1347_p3 = scmp.lt.u32.totalorder %s1343_s14, %s1587_s2 }
  0x27   :  { %p1349_p4 = pnand %p1347_p3, %p1344_p2 }
  0x29   :  { %1352 = shalt.err (!%p1349_p4)
}
  0x2a   :  { %s1353_s20 = scalar_lea.vmem %s41_s11, 512  ;;  %p1358_p6 = scmp.lt.s32.totalorder %s41_s11, %s41_s11 }
  0x2b   :  { %p1354_p5 = scmp.ne.s32.totalorder %s41_s11, %s1353_s20  ;;  %p1359_p7 = scmp.lt.s32.totalorder %s1353_s20, %s1353_s20 }
  0x2d   :  { %p1360_p8 = por %p1359_p7, %p1358_p6 }
  0x2f   :  { %p1361_p9 = pnand %p1360_p8, %p1354_p5 }
  0x31   :  { %1364 = shalt.err (!%p1361_p9)
}
  0x32   :  { %46 = dma.hbm_to_vmem [thread:$0]  %s1587_s2, 512, %s41_s11, [#allocation6], %s1395_s24, %s1395_s24, %s1396_s25  }
  0x33   :  { %1387 = dma.done.wait [#allocation3], 1024  }
  0x34   :  { %1388 = vsyncadd [#allocation3], 4294966272 }
  0x35   :  { %1389 = dma.done.wait [#allocation6], 1536  }
  0x36   :  { %1390 = vsyncadd [#allocation6], 4294965760  ;;  %vm60_vm0 = vcmask 261120   ;;  %v1398_v0 = vmov 0.0|0.0   ;;  %vm1399_vm1 = vmmov 0   ;;  %v1400_v1 = vmov 0.0  }
  0x37   :  { %1188 = vmatprep.subr.bf16.mxu0 %v1398_v0  ;;  %1108 = vmatprep.mubr.msk.f32.mxu0 %vm1399_vm1, %v1400_v1  ;;  %61 = vst.msk [vmem:[#allocation8] sm:$0xff] %vm60_vm0, %v1400_v1  ;;  %v1401_v2 = vmov 0   ;;  %v62_v3 = vld [vmem:[#allocation7] sm:$0xff]  ;;  %v63_v4 = vld [vmem:[#allocation7 + $0x8] sm:$0xff]  ;;  %v64_v5 = vld [vmem:[#allocation7 + $0x10] sm:$0xff]  ;;  %s1402_s2 = smov 32  }
  0x38   :  { %1249 = vset.pattern.permute.xlu1 %v1401_v2  ;;  %1194 = vmatprep.subr.bf16.mxu1 %v1398_v0  ;;  %v1486_v6 = vpack.c.bf16 %v63_v4, %v62_v3  ;;  %v65_v7 = vld [vmem:[#allocation7 + $0x18] sm:$0xff]  ;;  %v68_v8 = vld [vmem:[#allocation5] sm:$0xff]  ;;  %s1403_s21 = smov 64   ;;  %s1404_s22 = smov 96   ;;  %v193_v40 = vld [vmem:[#allocation5 + $0x8] sm:$0xff] }
  0x39   :  { %1119 = vmatprep.mubr.msk.f32.mxu1 %vm1399_vm1, %v1400_v1  ;;  %1250 = vset.pattern.permute.xlu0 %v1401_v2  ;;  %v178_v9 = vsub.f32 1.0, %v68_v8  ;;  %v1489_v10 = vpack.c.bf16 %v65_v7, %v64_v5  ;;  %v67_v14 = vld [vmem:[#allocation2] sm:$0xff]  ;;  %v191_v41 = vld [vmem:[#allocation2 + $0x8] sm:$0xff]  ;;  %v301_v49 = vsub.f32 1.0, %v193_v40  ;;  %v312_v4 = vld [vmem:[#allocation5 + $0x10] sm:$0xff]  ;;  %s1405_s23 = smov [#allocation8]  }
  0x3a   :  { %1190 = vmatpush3.bf16.msra.mxu0 %v1486_v6  ;;  %1196 = vmatpush3.bf16.msra.mxu1 %v1486_v6  ;;  %v310_v5 = vld [vmem:[#allocation2 + $0x10] sm:$0xff]  ;;  %s1034_s24 = sshll.u32 %s1405_s23, 4  ;;  %s1035_s24 = int_to_ptr.vmem [resolvable:$true] %s1034_s24 }
  0x3b   :  { %1191 = vmatprep.subr.bf16.mxu0 %v1398_v0  ;;  %181 = vperm.xlu1 %1249, %v178_v9   ;;  %s1365_s25 = scalar_lea.vmem %s1035_s24, 128  ;;  %p1370_p11 = scmp.lt.s32.totalorder %s1035_s24, %s1035_s24 }
  0x3c   :  { %1197 = vmatprep.subr.bf16.mxu1 %v1398_v0  ;;  %p1366_p10 = scmp.ne.s32.totalorder %s1035_s24, %s1365_s25  ;;  %p1371_p12 = scmp.lt.s32.totalorder %s1365_s25, %s1365_s25 }
  0x3e   :  { %1193 = vmatpush3.bf16.msra.mxu0 %v1489_v10  ;;  %v66_v11 = vld [vmem:[#allocation8] sm:$0xff]  ;;  %1199 = vmatpush3.bf16.msra.mxu1 %v1489_v10  ;;  %p1372_p13 = por %p1371_p12, %p1370_p11 }
  0x3f   :  { %174 = vperm.xlu1 %1249, %v68_v8   ;;  %1200 = vmatprep.subr.bf16.mxu0 %v1398_v0 }
  0x40   :  { %1206 = vmatprep.subr.bf16.mxu1 %v1398_v0  ;;  %p1373_p0 = pnand %p1372_p13, %p1366_p10 }
  0x41   :  { %1109 = vmatmul.mubr.msk.f32.vlgmr.msra.gmra.mrb[0].mxu0 %vm60_vm0, %v66_v11 }
  0x42   :  { %1202 = vmatpush3.bf16.msra.mxu0 %v1486_v6  ;;  %1130 = vmatprep.mubr.msk.f32.mxu0 %vm1399_vm1, %v1400_v1 }
  0x43   :  { %167 = vrot.lane.b32.xlu1 %v66_v11, %s1402_s2  ;;  %1203 = vmatprep.subr.bf16.mxu0 %v1398_v0 }
  0x46   :  { %1205 = vmatpush3.bf16.msra.mxu0 %v1489_v10 }
  0x47   :  { %1212 = vmatprep.subr.bf16.mxu0 %v1398_v0 }
  0xba   :  { %v182_v25 = vpop.permute.xlu1 %181 }
  0xbb   :  { %v184_v26 = vmul.f32 %v182_v25, %v66_v11 }
  0xbe   :  { %v175_v27 = vpop.permute.xlu1 %174 }
  0xc2   :  { %v168_v28 = vpop.permute.xlu1 %167 }
 0x114   :  { %v139_v12 = vpop.f32.mrb[0].mxu0 }
 0x115   :  { %151 = vrot.lane.b32.xlu0 %v139_v12, %s1403_s21  ;;  %v1110_v13 = vpop.f32.mrb[1].mxu0  ;;  %v143_v15 = vadd.f32 %v139_v12, %v67_v14 }
 0x117   :  { %v1045_v16 = vmul.f32 -1.442695, %v143_v15  ;;  %v420_v15 = vsub.f32 1.0, %v312_v4 }
 0x119   :  { %1251 = vpow2.f32 %v1045_v16 }
 0x123   :  { %v1252_v17 = vpop.eup %1251 }
 0x124   :  { %v147_v18 = vadd.f32 1.0, %v1252_v17 }
 0x126   :  { %1253 = vrcp.f32 %v147_v18 }
 0x130   :  { %v1254_v19 = vpop.eup %1253 }
 0x131   :  { %v161_v29 = vsub.f32 1.0, %v1254_v19  ;;  %v170_v31 = vmul.f32 %v1254_v19, %v168_v28 }
 0x187   :  { %v152_v20 = vpop.permute.xlu0 %151 }
 0x188   :  { %v154_v21 = vmul.f32 %v1254_v19, %v152_v20 }
 0x18a   :  { %156 = vrot.lane.b32.xlu0 %v154_v21, %s1403_s21 }
 0x1fc   :  { %v157_v22 = vpop.permute.xlu0 %156 }
 0x1fd   :  { %v159_v23 = vadd.f32 %v157_v22, %v67_v14 }
 0x1ff   :  { %1255 = vtanh.f32 %v159_v23 }
 0x209   :  { %v1256_v24 = vpop.eup %1255 }
 0x20a   :  { %163 = vrot.lane.b32.xlu0 %v1256_v24, %s1404_s22 }
 0x20e   :  { %186 = vrot.lane.b32.xlu0 %v184_v26, %s1402_s2 }
 0x27c   :  { %v164_v30 = vpop.permute.xlu0 %163 }
 0x27d   :  { %v166_v32 = vmul.f32 %v164_v30, %v161_v29 }
 0x27f   :  { %v171_v33 = vadd.f32 %v170_v31, %v166_v32  ;;  %v431_v32 = vld [vmem:[#allocation5 + $0x18] sm:$0xff] }
 0x280   :  { %v187_v34 = vpop.permute.xlu0 %186 }
 0x281   :  { %v177_v35 = vmul.f32 %v175_v27, %v171_v33  ;;  %v429_v33 = vld [vmem:[#allocation2 + $0x18] sm:$0xff] }
 0x283   :  { %v189_v36 = vadd.f32 %v187_v34, %v177_v35 }
 0x285   :  { %195 = vrot.lane.b32.xlu1 %v189_v36, %s1404_s22 }
 0x2f7   :  { %v196_v37 = vpop.permute.xlu1 %195 }
 0x2f8   :  { %1120 = vmatmul.mubr.msk.f32.vlgmr.msra.gmra.mrb[0].mxu1 %vm60_vm0, %v196_v37 }
 0x2f9   :  { %1208 = vmatpush3.bf16.msra.mxu1 %v1486_v6  ;;  %1141 = vmatprep.mubr.msk.f32.mxu1 %vm1399_vm1, %v1400_v1 }
 0x2fa   :  { %1209 = vmatprep.subr.bf16.mxu1 %v1398_v0 }
 0x2fd   :  { %1211 = vmatpush3.bf16.msra.mxu1 %v1489_v10 }
 0x2fe   :  { %1218 = vmatprep.subr.bf16.mxu1 %v1398_v0 }
 0x3cb   :  { %v265_v38 = vpop.f32.mrb[0].mxu1 }
 0x3cc   :  { %277 = vrot.lane.b32.xlu0 %v265_v38, %s1403_s21  ;;  %v1121_v39 = vpop.f32.mrb[1].mxu1  ;;  %v269_v42 = vadd.f32 %v265_v38, %v191_v41 }
 0x3ce   :  { %v1047_v43 = vmul.f32 -1.442695, %v269_v42 }
 0x3d0   :  { %297 = vperm.xlu0 %1250, %v193_v40   ;;  %1257 = vpow2.f32 %v1047_v43 }
 0x3da   :  { %v1258_v44 = vpop.eup %1257 }
 0x3db   :  { %v273_v45 = vadd.f32 1.0, %v1258_v44 }
 0x3dd   :  { %1259 = vrcp.f32 %v273_v45 }
 0x3e7   :  { %v1260_v46 = vpop.eup %1259 }
 0x3e8   :  { %v287_v54 = vsub.f32 1.0, %v1260_v46  ;;  %v293_v57 = vmul.f32 %v1260_v46, %v189_v36 }
 0x43e   :  { %v278_v47 = vpop.permute.xlu0 %277 }
 0x43f   :  { %v280_v48 = vmul.f32 %v1260_v46, %v278_v47 }
 0x441   :  { %282 = vrot.lane.b32.xlu1 %v280_v48, %s1403_s21 }
 0x445   :  { %304 = vperm.xlu1 %1249, %v301_v49  }
 0x44f   :  { %v298_v58 = vpop.permute.xlu0 %297 }
 0x4b3   :  { %v283_v50 = vpop.permute.xlu1 %282 }
 0x4b4   :  { %v285_v51 = vadd.f32 %v283_v50, %v191_v41  ;;  %v539_v41 = vsub.f32 1.0, %v431_v32 }
 0x4b6   :  { %1261 = vtanh.f32 %v285_v51 }
 0x4c0   :  { %v1262_v52 = vpop.eup %1261 }
 0x4c1   :  { %289 = vrot.lane.b32.xlu1 %v1262_v52, %s1404_s22 }
 0x4c4   :  { %v305_v53 = vpop.permute.xlu1 %304 }
 0x4c5   :  { %v307_v60 = vmul.f32 %v305_v53, %v189_v36 }
 0x533   :  { %v290_v55 = vpop.permute.xlu1 %289 }
 0x534   :  { %v292_v56 = vmul.f32 %v290_v55, %v287_v54 }
 0x536   :  { %v294_v59 = vadd.f32 %v293_v57, %v292_v56 }
 0x538   :  { %v300_v61 = vmul.f32 %v298_v58, %v294_v59  ;;  %v550_v58 = vld [vmem:[#allocation5 + $0x20] sm:$0xff] }
 0x539   :  { %v548_v59 = vld [vmem:[#allocation2 + $0x20] sm:$0xff] }
 0x53a   :  { %v308_v62 = vadd.f32 %v307_v60, %v300_v61 }
 0x53c   :  { %314 = vrot.lane.b32.xlu0 %v308_v62, %s1404_s22 }
 0x5ae   :  { %v315_v63 = vpop.permute.xlu0 %314 }
 0x5af   :  { %1131 = vmatmul.mubr.msk.f32.vlgmr.msra.gmra.mrb[2].mxu0 %vm60_vm0, %v315_v63 }
 0x5b0   :  { %1214 = vmatpush3.bf16.msra.mxu0 %v1486_v6  ;;  %1152 = vmatprep.mubr.msk.f32.mxu0 %vm1399_vm1, %v1400_v1 }
 0x5b1   :  { %1215 = vmatprep.subr.bf16.mxu0 %v1398_v0 }
 0x5b4   :  { %1217 = vmatpush3.bf16.msra.mxu0 %v1489_v10 }
 0x5b5   :  { %1224 = vmatprep.subr.bf16.mxu0 %v1398_v0 }
 0x682   :  { %v384_v2 = vpop.f32.mrb[2].mxu0 }
 0x683   :  { %396 = vrot.lane.b32.xlu1 %v384_v2, %s1403_s21  ;;  %v1132_v3 = vpop.f32.mrb[3].mxu0  ;;  %v388_v7 = vadd.f32 %v384_v2, %v310_v5 }
 0x685   :  { %v1049_v8 = vmul.f32 -1.442695, %v388_v7 }
 0x687   :  { %416 = vperm.xlu1 %1249, %v312_v4   ;;  %1263 = vpow2.f32 %v1049_v8 }
 0x691   :  { %v1264_v9 = vpop.eup %1263 }
 0x692   :  { %v392_v11 = vadd.f32 1.0, %v1264_v9 }
 0x694   :  { %1265 = vrcp.f32 %v392_v11 }
 0x69e   :  { %v1266_v12 = vpop.eup %1265 }
 0x69f   :  { %v406_v20 = vsub.f32 1.0, %v1266_v12  ;;  %v412_v22 = vmul.f32 %v1266_v12, %v308_v62 }
 0x6f5   :  { %v397_v13 = vpop.permute.xlu1 %396 }
 0x6f6   :  { %v399_v14 = vmul.f32 %v1266_v12, %v397_v13 }
 0x6f8   :  { %401 = vrot.lane.b32.xlu0 %v399_v14, %s1403_s21 }
 0x6fc   :  { %423 = vperm.xlu0 %1250, %v420_v15  }
 0x706   :  { %v417_v19 = vpop.permute.xlu1 %416 }
 0x76a   :  { %v402_v16 = vpop.permute.xlu0 %401 }
 0x76b   :  { %v404_v17 = vadd.f32 %v402_v16, %v310_v5  ;;  %v658_v5 = vsub.f32 1.0, %v550_v58 }
 0x76d   :  { %1267 = vtanh.f32 %v404_v17 }
 0x777   :  { %v1268_v18 = vpop.eup %1267 }
 0x778   :  { %408 = vrot.lane.b32.xlu1 %v1268_v18, %s1404_s22 }
 0x77b   :  { %v424_v24 = vpop.permute.xlu0 %423 }
 0x77c   :  { %v426_v26 = vmul.f32 %v424_v24, %v308_v62  ;;  %v669_v24 = vld [vmem:[#allocation5 + $0x28] sm:$0xff] }
 0x7ea   :  { %v409_v21 = vpop.permute.xlu1 %408 }
 0x7eb   :  { %v411_v23 = vmul.f32 %v409_v21, %v406_v20 }
 0x7ed   :  { %v413_v25 = vadd.f32 %v412_v22, %v411_v23 }
 0x7ef   :  { %v419_v27 = vmul.f32 %v417_v19, %v413_v25  ;;  %v667_v25 = vld [vmem:[#allocation2 + $0x28] sm:$0xff] }
 0x7f1   :  { %v427_v28 = vadd.f32 %v426_v26, %v419_v27 }
 0x7f3   :  { %433 = vrot.lane.b32.xlu0 %v427_v28, %s1404_s22 }
 0x865   :  { %v434_v29 = vpop.permute.xlu0 %433 }
 0x866   :  { %1142 = vmatmul.mubr.msk.f32.vlgmr.msra.gmra.mrb[2].mxu1 %vm60_vm0, %v434_v29 }
 0x867   :  { %1220 = vmatpush3.bf16.msra.mxu1 %v1486_v6  ;;  %1163 = vmatprep.mubr.msk.f32.mxu1 %vm1399_vm1, %v1400_v1 }
 0x868   :  { %1221 = vmatprep.subr.bf16.mxu1 %v1398_v0 }
 0x86b   :  { %1223 = vmatpush3.bf16.msra.mxu1 %v1489_v10 }
 0x86c   :  { %1230 = vmatprep.subr.bf16.mxu1 %v1398_v0 }
 0x939   :  { %v503_v30 = vpop.f32.mrb[2].mxu1 }
 0x93a   :  { %515 = vrot.lane.b32.xlu1 %v503_v30, %s1403_s21  ;;  %v1143_v31 = vpop.f32.mrb[3].mxu1  ;;  %v507_v34 = vadd.f32 %v503_v30, %v429_v33 }
 0x93b   :  { %v777_v31 = vsub.f32 1.0, %v669_v24 }
 0x93c   :  { %v1051_v35 = vmul.f32 -1.442695, %v507_v34 }
 0x93e   :  { %535 = vperm.xlu1 %1249, %v431_v32   ;;  %1269 = vpow2.f32 %v1051_v35 }
 0x948   :  { %v1270_v36 = vpop.eup %1269 }
 0x949   :  { %v511_v37 = vadd.f32 1.0, %v1270_v36 }
 0x94b   :  { %1271 = vrcp.f32 %v511_v37 }
 0x955   :  { %v1272_v38 = vpop.eup %1271 }
 0x956   :  { %v525_v46 = vsub.f32 1.0, %v1272_v38  ;;  %v531_v48 = vmul.f32 %v1272_v38, %v427_v28 }
 0x9ac   :  { %v516_v39 = vpop.permute.xlu1 %515 }
 0x9ad   :  { %v518_v40 = vmul.f32 %v1272_v38, %v516_v39 }
 0x9af   :  { %520 = vrot.lane.b32.xlu0 %v518_v40, %s1403_s21 }
 0x9b3   :  { %542 = vperm.xlu0 %1250, %v539_v41  }
 0x9bd   :  { %v536_v45 = vpop.permute.xlu1 %535 }
 0xa21   :  { %v521_v42 = vpop.permute.xlu0 %520 }
 0xa22   :  { %v523_v43 = vadd.f32 %v521_v42, %v429_v33 }
 0xa24   :  { %1273 = vtanh.f32 %v523_v43 }
 0xa2e   :  { %v1274_v44 = vpop.eup %1273 }
 0xa2f   :  { %527 = vrot.lane.b32.xlu1 %v1274_v44, %s1404_s22 }
 0xa32   :  { %v543_v50 = vpop.permute.xlu0 %542 }
 0xa33   :  { %v545_v52 = vmul.f32 %v543_v50, %v427_v28 }
 0xaa1   :  { %v528_v47 = vpop.permute.xlu1 %527 }
 0xaa2   :  { %v530_v49 = vmul.f32 %v528_v47, %v525_v46  ;;  %v788_v46 = vld [vmem:[#allocation5 + $0x30] sm:$0xff] }
 0xaa3   :  { %v786_v47 = vld [vmem:[#allocation2 + $0x30] sm:$0xff] }
 0xaa4   :  { %v532_v51 = vadd.f32 %v531_v48, %v530_v49 }
 0xaa6   :  { %v538_v53 = vmul.f32 %v536_v45, %v532_v51 }
 0xaa8   :  { %v546_v54 = vadd.f32 %v545_v52, %v538_v53 }
 0xaaa   :  { %552 = vrot.lane.b32.xlu0 %v546_v54, %s1404_s22 }
 0xb1c   :  { %v553_v55 = vpop.permute.xlu0 %552 }
 0xb1d   :  { %1153 = vmatmul.mubr.msk.f32.vlgmr.msra.gmra.mrb[4].mxu0 %vm60_vm0, %v553_v55  ;;  %v896_v55 = vsub.f32 1.0, %v788_v46 }
 0xb1e   :  { %1226 = vmatpush3.bf16.msra.mxu0 %v1486_v6  ;;  %1174 = vmatprep.mubr.msk.f32.mxu0 %vm1399_vm1, %v1400_v1 }
 0xb1f   :  { %1227 = vmatprep.subr.bf16.mxu0 %v1398_v0 }
 0xb22   :  { %1229 = vmatpush3.bf16.msra.mxu0 %v1489_v10 }
 0xbf0   :  { %v622_v56 = vpop.f32.mrb[4].mxu0 }
 0xbf1   :  { %634 = vrot.lane.b32.xlu1 %v622_v56, %s1403_s21  ;;  %v1154_v57 = vpop.f32.mrb[5].mxu0  ;;  %v626_v60 = vadd.f32 %v622_v56, %v548_v59 }
 0xbf3   :  { %v1053_v61 = vmul.f32 -1.442695, %v626_v60 }
 0xbf5   :  { %654 = vperm.xlu1 %1249, %v550_v58   ;;  %1275 = vpow2.f32 %v1053_v61 }
 0xbff   :  { %v1276_v62 = vpop.eup %1275 }
 0xc00   :  { %v630_v63 = vadd.f32 1.0, %v1276_v62 }
 0xc02   :  { %1277 = vrcp.f32 %v630_v63 }
 0xc0c   :  { %v1278_v2 = vpop.eup %1277 }
 0xc0d   :  { %v644_v12 = vsub.f32 1.0, %v1278_v2  ;;  %v650_v14 = vmul.f32 %v1278_v2, %v546_v54 }
 0xc63   :  { %v635_v3 = vpop.permute.xlu1 %634 }
 0xc64   :  { %v637_v4 = vmul.f32 %v1278_v2, %v635_v3 }
 0xc66   :  { %639 = vrot.lane.b32.xlu0 %v637_v4, %s1403_s21 }
 0xc6a   :  { %661 = vperm.xlu0 %1250, %v658_v5  }
 0xc74   :  { %v655_v11 = vpop.permute.xlu1 %654 }
 0xcd8   :  { %v640_v7 = vpop.permute.xlu0 %639 }
 0xcd9   :  { %v642_v8 = vadd.f32 %v640_v7, %v548_v59 }
 0xcdb   :  { %1279 = vtanh.f32 %v642_v8 }
 0xce5   :  { %v1280_v9 = vpop.eup %1279 }
 0xce6   :  { %646 = vrot.lane.b32.xlu1 %v1280_v9, %s1404_s22 }
 0xce9   :  { %v662_v16 = vpop.permute.xlu0 %661 }
 0xcea   :  { %v664_v18 = vmul.f32 %v662_v16, %v546_v54 }
 0xd58   :  { %v647_v13 = vpop.permute.xlu1 %646 }
 0xd59   :  { %v649_v15 = vmul.f32 %v647_v13, %v644_v12  ;;  %v907_v12 = vld [vmem:[#allocation5 + $0x38] sm:$0xff] }
 0xd5a   :  { %v905_v13 = vld [vmem:[#allocation2 + $0x38] sm:$0xff] }
 0xd5b   :  { %v651_v17 = vadd.f32 %v650_v14, %v649_v15 }
 0xd5d   :  { %v657_v19 = vmul.f32 %v655_v11, %v651_v17 }
 0xd5f   :  { %v665_v20 = vadd.f32 %v664_v18, %v657_v19 }
 0xd61   :  { %671 = vrot.lane.b32.xlu0 %v665_v20, %s1404_s22 }
 0xdd3   :  { %v672_v21 = vpop.permute.xlu0 %671 }
 0xdd4   :  { %1164 = vmatmul.mubr.msk.f32.vlgmr.msra.gmra.mrb[4].mxu1 %vm60_vm0, %v672_v21  ;;  %v1015_v21 = vsub.f32 1.0, %v907_v12 }
 0xdd5   :  { %1232 = vmatpush3.bf16.msra.mxu1 %v1486_v6  ;;  %1185 = vmatprep.mubr.msk.f32.mxu1 %vm1399_vm1, %v1400_v1 }
 0xdd6   :  { %1233 = vmatprep.subr.bf16.mxu1 %v1398_v0 }
 0xdd9   :  { %1235 = vmatpush3.bf16.msra.mxu1 %v1489_v10 }
 0xea7   :  { %v741_v22 = vpop.f32.mrb[4].mxu1 }
 0xea8   :  { %753 = vrot.lane.b32.xlu1 %v741_v22, %s1403_s21  ;;  %v1165_v23 = vpop.f32.mrb[5].mxu1  ;;  %v745_v26 = vadd.f32 %v741_v22, %v667_v25 }
 0xeaa   :  { %v1055_v27 = vmul.f32 -1.442695, %v745_v26 }
 0xeac   :  { %773 = vperm.xlu1 %1249, %v669_v24   ;;  %1281 = vpow2.f32 %v1055_v27 }
 0xeb6   :  { %v1282_v28 = vpop.eup %1281 }
 0xeb7   :  { %v749_v29 = vadd.f32 1.0, %v1282_v28 }
 0xeb9   :  { %1283 = vrcp.f32 %v749_v29 }
 0xec3   :  { %v1284_v6 = vpop.eup %1283 }
 0xec4   :  { %v763_v34 = vsub.f32 1.0, %v1284_v6  ;;  %v769_v36 = vmul.f32 %v1284_v6, %v665_v20 }
 0xf1a   :  { %v754_v30 = vpop.permute.xlu1 %753 }
 0xf1b   :  { %v756_v1 = vmul.f32 %v1284_v6, %v754_v30 }
 0xf1d   :  { %758 = vrot.lane.b32.xlu0 %v756_v1, %s1403_s21 }
 0xf21   :  { %780 = vperm.xlu0 %1250, %v777_v31  }
 0xf2b   :  { %v774_v33 = vpop.permute.xlu1 %773 }
 0xf8f   :  { %v759_v0 = vpop.permute.xlu0 %758 }
 0xf90   :  { %v761_v10 = vadd.f32 %v759_v0, %v667_v25 }
 0xf92   :  { %1285 = vtanh.f32 %v761_v10 }
 0xf9c   :  { %v1286_v32 = vpop.eup %1285 }
 0xf9d   :  { %765 = vrot.lane.b32.xlu1 %v1286_v32, %s1404_s22 }
 0xfa0   :  { %v781_v38 = vpop.permute.xlu0 %780 }
 0xfa1   :  { %v783_v40 = vmul.f32 %v781_v38, %v665_v20 }
0x100f   :  { %v766_v35 = vpop.permute.xlu1 %765 }
0x1010   :  { %v768_v37 = vmul.f32 %v766_v35, %v763_v34 }
0x1012   :  { %v770_v39 = vadd.f32 %v769_v36, %v768_v37 }
0x1014   :  { %v776_v41 = vmul.f32 %v774_v33, %v770_v39 }
0x1016   :  { %v784_v42 = vadd.f32 %v783_v40, %v776_v41 }
0x1018   :  { %790 = vrot.lane.b32.xlu0 %v784_v42, %s1404_s22 }
0x108a   :  { %v791_v43 = vpop.permute.xlu0 %790 }
0x108b   :  { %1175 = vmatmul.mubr.msk.f32.vlgmr.msra.gmra.mrb[6].mxu0 %vm60_vm0, %v791_v43 }
0x115e   :  { %v860_v44 = vpop.f32.mrb[6].mxu0 }
0x115f   :  { %872 = vrot.lane.b32.xlu1 %v860_v44, %s1403_s21  ;;  %v1176_v45 = vpop.f32.mrb[7].mxu0  ;;  %v864_v48 = vadd.f32 %v860_v44, %v786_v47 }
0x1161   :  { %v1057_v49 = vmul.f32 -1.442695, %v864_v48 }
0x1163   :  { %892 = vperm.xlu1 %1249, %v788_v46   ;;  %1287 = vpow2.f32 %v1057_v49 }
0x116d   :  { %v1288_v50 = vpop.eup %1287 }
0x116e   :  { %v868_v51 = vadd.f32 1.0, %v1288_v50 }
0x1170   :  { %1289 = vrcp.f32 %v868_v51 }
0x117a   :  { %v1290_v52 = vpop.eup %1289 }
0x117b   :  { %v882_v60 = vsub.f32 1.0, %v1290_v52  ;;  %v888_v62 = vmul.f32 %v1290_v52, %v784_v42 }
0x11d1   :  { %v873_v53 = vpop.permute.xlu1 %872 }
0x11d2   :  { %v875_v54 = vmul.f32 %v1290_v52, %v873_v53 }
0x11d4   :  { %877 = vrot.lane.b32.xlu0 %v875_v54, %s1403_s21 }
0x11d8   :  { %899 = vperm.xlu0 %1250, %v896_v55  }
0x11e2   :  { %v893_v59 = vpop.permute.xlu1 %892 }
0x1246   :  { %v878_v56 = vpop.permute.xlu0 %877 }
0x1247   :  { %v880_v57 = vadd.f32 %v878_v56, %v786_v47 }
0x1249   :  { %1291 = vtanh.f32 %v880_v57 }
0x1253   :  { %v1292_v58 = vpop.eup %1291 }
0x1254   :  { %884 = vrot.lane.b32.xlu1 %v1292_v58, %s1404_s22 }
0x1257   :  { %v900_v2 = vpop.permute.xlu0 %899 }
0x1258   :  { %v902_v4 = vmul.f32 %v900_v2, %v784_v42 }
0x12c6   :  { %v885_v61 = vpop.permute.xlu1 %884 }
0x12c7   :  { %v887_v63 = vmul.f32 %v885_v61, %v882_v60 }
0x12c9   :  { %v889_v3 = vadd.f32 %v888_v62, %v887_v63 }
0x12cb   :  { %v895_v5 = vmul.f32 %v893_v59, %v889_v3 }
0x12cd   :  { %v903_v7 = vadd.f32 %v902_v4, %v895_v5 }
0x12cf   :  { %909 = vrot.lane.b32.xlu0 %v903_v7, %s1404_s22 }
0x1341   :  { %v910_v8 = vpop.permute.xlu0 %909 }
0x1342   :  { %1186 = vmatmul.mubr.msk.f32.vlgmr.msra.gmra.mrb[6].mxu1 %vm60_vm0, %v910_v8 }
0x1415   :  { %v979_v9 = vpop.f32.mrb[6].mxu1 }
0x1416   :  { %991 = vrot.lane.b32.xlu1 %v979_v9, %s1403_s21  ;;  %v1187_v11 = vpop.f32.mrb[7].mxu1  ;;  %v983_v14 = vadd.f32 %v979_v9, %v905_v13 }
0x1418   :  { %v1059_v15 = vmul.f32 -1.442695, %v983_v14 }
0x141a   :  { %1011 = vperm.xlu1 %1249, %v907_v12   ;;  %1293 = vpow2.f32 %v1059_v15 }
0x1424   :  { %v1294_v16 = vpop.eup %1293 }
0x1425   :  { %v987_v17 = vadd.f32 1.0, %v1294_v16 }
0x1427   :  { %1295 = vrcp.f32 %v987_v17 }
0x1431   :  { %v1296_v18 = vpop.eup %1295 }
0x1432   :  { %v1001_v26 = vsub.f32 1.0, %v1296_v18  ;;  %v1007_v28 = vmul.f32 %v1296_v18, %v903_v7 }
0x1488   :  { %v992_v19 = vpop.permute.xlu1 %991 }
0x1489   :  { %v994_v20 = vmul.f32 %v1296_v18, %v992_v19 }
0x148b   :  { %996 = vrot.lane.b32.xlu0 %v994_v20, %s1403_s21 }
0x148f   :  { %1018 = vperm.xlu0 %1250, %v1015_v21  }
0x1499   :  { %v1012_v25 = vpop.permute.xlu1 %1011 }
0x14fd   :  { %v997_v22 = vpop.permute.xlu0 %996 }
0x14fe   :  { %v999_v23 = vadd.f32 %v997_v22, %v905_v13 }
0x1500   :  { %1297 = vtanh.f32 %v999_v23 }
0x150a   :  { %v1298_v24 = vpop.eup %1297 }
0x150b   :  { %1003 = vrot.lane.b32.xlu1 %v1298_v24, %s1404_s22 }
0x150e   :  { %v1019_v6 = vpop.permute.xlu0 %1018 }
0x150f   :  { %v1021_v1 = vmul.f32 %v1019_v6, %v903_v7 }
0x157d   :  { %v1004_v27 = vpop.permute.xlu1 %1003 }
0x157e   :  { %v1006_v29 = vmul.f32 %v1004_v27, %v1001_v26 }
0x1580   :  { %v1008_v30 = vadd.f32 %v1007_v28, %v1006_v29 }
0x1582   :  { %v1014_v31 = vmul.f32 %v1012_v25, %v1008_v30 }
0x1584   :  { %v1022_v0 = vadd.f32 %v1021_v1, %v1014_v31 }
0x1586   :  { %1024 = vrot.lane.b32.xlu0 %v1022_v0, %s1404_s22 }
0x15f8   :  { %v1025_v10 = vpop.permute.xlu0 %1024 }
0x15f9   :  { %1027 = vst.msk [vmem:[#allocation8] sm:$0xff] %vm60_vm0, %v1025_v10 }
0x15fa   :  { %1376 = shalt.err (!%p1373_p0)
}
0x15fb   :  { %s1377_s28 = scalar_lea.hbm %s1588_s3, 128 }
0x15fc   :  { %p1378_p1 = scmp.ne.s32.totalorder %s1588_s3, %s1377_s28  ;;  %p1381_p2 = scmp.lt.u32.totalorder %s1377_s28, %s1588_s3 }
0x15fe   :  { %p1383_p3 = pnand %p1381_p2, %p1378_p1 }
0x1600   :  { %1386 = shalt.err (!%p1383_p3)
}
0x1601   :  { %1037 = dma.vmem_to_hbm [thread:$0]  %s1035_s24, 128, %s1588_s3, [#allocation4]  }
0x1602   :  { %1391 = dma.done.wait [#allocation4], 128  }
0x1603   :  { %1392 = vsyncadd [#allocation4], 4294967168 }
0x1604   :  { %1041 = vsyncpa [#allocation3], 1 }
0x1605   :  { %1042 = vsyncpa [#allocation6], 1 }
0x1606   :  { %1043 = vsyncpa [#allocation4], 1 }

</bundles_post_ra>
